<compile_context>
chip_gen: v7x
topology: tpu7x:2x2x1
jax: 0.10.0
libtpu: 0.0.40
codegen_flags: <defaults>
</compile_context>

<pallas_src>
import functools

import jax
import jax.numpy as jnp
from jax import lax
from jax.experimental import pallas as pl
from jax.experimental.pallas import tpu as pltpu


_SQRT_HALF = 0.7071067811865476


def _reciprocal_f32(x):
    # Approx reciprocal runs on the EUP (which only carries the exp here);
    # one Newton step restores ~f32 accuracy so the 2e-4 tolerance still holds.
    r = pl.reciprocal(x, approx=True)
    return r * (2.0 - x * r)


def _erf_f32(x):
    """Abramowitz & Stegun 7.1.26 erf approximation, |abs err| < 1.5e-7."""
    ax = jnp.abs(x)
    t = _reciprocal_f32(1.0 + 0.3275911 * ax)
    poly = t * (0.254829592
                + t * (-0.284496736
                       + t * (1.421413741
                              + t * (-1.453152027 + t * 1.061405429))))
    y = 1.0 - poly * jnp.exp(-ax * ax)
    return jnp.where(x >= 0.0, y, -y)


def _gelu_exact(x):
    # PyTorch F.gelu default = exact erf gelu (NOT the tanh approximation).
    return 0.5 * x * (1.0 + _erf_f32(x * _SQRT_HALF))


def _mm(w, x, use_mxu, mxu_dtype):
    """w: (M, K) f32, x: (K, N) f32 -> (M, N) f32."""
    if use_mxu:
        return jnp.dot(w.astype(mxu_dtype), x.astype(mxu_dtype),
                       preferred_element_type=jnp.float32)
    # Tiny contraction: K broadcast-MACs on the VPU beat a >95%-padded MXU pass.
    k_dim = w.shape[1]
    out = w[:, 0:1] * x[0:1, :]
    for k in range(1, k_dim):
        out = out + w[:, k:k + 1] * x[k:k + 1, :]
    return out


def _ffn_kernel(*refs, hidden, W, rows_per_tile, n_row_tiles, has_bias,
                use_mxu_in, use_mxu_out, mxu_dtype):
    if has_bias:
        (xc_ref, xp_ref, xn_ref, w_in_ref, w_dw_ref, w_out_ref,
         b_in_ref, b_dw_ref, b_out_ref, o_ref) = refs
    else:
        (xc_ref, xp_ref, xn_ref, w_in_ref, w_dw_ref, w_out_ref, o_ref) = refs

    c2 = 2 * hidden
    thw = rows_per_tile * W
    hwp = thw + 2 * W + 2          # 1-row halo each side + 1 pad column each end

    j = pl.program_id(1)

    # ---- build the haloed input slab (channels are small -> cheap) ----------
    x_cur = xc_ref[0].astype(jnp.float32)                    # (dim, thw)
    prev_row = xp_ref[0][:, thw - W:].astype(jnp.float32)    # last row of tile j-1
    next_row = xn_ref[0][:, :W].astype(jnp.float32)          # first row of tile j+1
    dim = x_cur.shape[0]
    pad = jnp.zeros((dim, 1), jnp.float32)
    x_slab = jnp.concatenate([pad, prev_row, x_cur, next_row, pad], axis=-1)

    w_in = w_in_ref[...].astype(jnp.float32)                 # (c2, dim)
    w_dw = w_dw_ref[...].astype(jnp.float32)                 # (c2, 9)
    w_out = w_out_ref[...].astype(jnp.float32)               # (dim, hidden)

    # ---- project_in (1x1 conv == channel matmul) on the haloed slab ---------
    y = _mm(w_in, x_slab, use_mxu_in, mxu_dtype)             # (c2, hwp)
    if has_bias:
        y = y + b_in_ref[...].astype(jnp.float32)

    # ---- masks from a single (1, hwp) iota row -------------------------------
    q = lax.broadcasted_iota(jnp.int32, (1, hwp), 1)
    colq = lax.rem(q, W)
    top_keep = (j > 0).astype(jnp.float32)                   # zero top halo at image top
    bot_keep = (j < n_row_tiles - 1).astype(jnp.float32)     # zero bottom halo at image bottom
    in_top = jnp.logical_and(q >= 1, q < W + 1)
    in_bot = jnp.logical_and(q >= thw + W + 1, q < thw + 2 * W + 1)
    keep = jnp.where(in_top, top_keep, jnp.where(in_bot, bot_keep, 1.0))

    # dj-variant slabs; column masks are W-periodic so they commute with row shifts.
    y0 = y * keep                                            # dj =  0
    ym = y0 * (colq != 0).astype(jnp.float32)                # dj = -1 (no left neighbour at col 0)
    yp = y0 * (colq != 1).astype(jnp.float32)                # dj = +1 (no right neighbour at col W-1)
    slabs = {-1: ym, 0: y0, 1: yp}

    # ---- 3x3 depthwise conv: 9 static-offset slices + MAC --------------------
    z = None
    for di in (-1, 0, 1):
        for dj in (-1, 0, 1):
            tap = (di + 1) * 3 + (dj + 1)
            start = (di + 1) * W + (dj + 1)
            contrib = w_dw[:, tap:tap + 1] * slabs[dj][:, start:start + thw]
            z = contrib if z is None else z + contrib
    if has_bias:
        z = z + b_dw_ref[...].astype(jnp.float32)

    # ---- chunk(2, dim=channels) + gated gelu ---------------------------------
    x1 = z[:hidden, :]
    x2 = z[hidden:, :]
    g = _gelu_exact(x1) * x2                                  # (hidden, thw)

    # ---- project_out (1x1 conv == channel matmul) ----------------------------
    out = _mm(w_out, g, use_mxu_out, mxu_dtype)               # (dim, thw)
    if has_bias:
        out = out + b_out_ref[...].astype(jnp.float32)

    o_ref[0] = out.astype(o_ref.dtype)


def _vmem_capacity_bytes():
    try:
        info = pltpu.get_tpu_info()
        for attr in ("vmem_capacity_bytes", "vmem_bytes", "vmem_size_bytes"):
            v = getattr(info, attr, None)
            if v:
                return int(v)
    except Exception:
        pass
    return 64 * 1024 * 1024   # conservative: v7x per-TensorCore VMEM


def _pick_rows_per_tile(H, W, c2, budget_bytes):
    """Largest divisor of H whose working set fits the budget and whose lane
    extent (rows*W) is a multiple of 128 (or the full plane)."""
    bytes_per_row = 10 * c2 * W * 4      # ~10 live f32 planes of (c2, rows*W)
    max_rows = max(1, budget_bytes // bytes_per_row)
    best = None
    for d in range(1, H + 1):
        if H % d:
            continue
        aligned = (d * W) % 128 == 0 or d == H
        if aligned and d <= max_rows:
            best = d
    if best is None:
        for d in range(1, H + 1):        # over budget: smallest aligned divisor
            if H % d == 0 and ((d * W) % 128 == 0 or d == H):
                best = d
                break
    return best if best is not None else H


class FeedForwardPallas:
    """JAX/Pallas equivalent of ERVSR FeedForward(dim, ffn_expansion_factor, bias)."""

    def __init__(self, dim, ffn_expansion_factor, bias, key=None):
        self.dim = dim
        self.hidden = int(dim * ffn_expansion_factor)
        self.has_bias = bool(bias)
        c2 = 2 * self.hidden
        if key is None:
            key = jax.random.PRNGKey(0)
        k = jax.random.split(key, 6)
        # Deterministic fan-in scaled init (forward semantics only).
        self.w_in = jax.random.normal(k[0], (c2, dim), jnp.float32) / float(dim) ** 0.5
        self.w_dw = jax.random.normal(k[1], (c2, 3, 3), jnp.float32) / 3.0
        self.w_out = (jax.random.normal(k[2], (dim, self.hidden), jnp.float32)
                      / float(self.hidden) ** 0.5)
        if self.has_bias:
            self.b_in = 0.1 * jax.random.normal(k[3], (c2,), jnp.float32)
            self.b_dw = 0.1 * jax.random.normal(k[4], (c2,), jnp.float32)
            self.b_out = 0.1 * jax.random.normal(k[5], (dim,), jnp.float32)
        else:
            self.b_in = self.b_dw = self.b_out = None

    def __call__(self, x, rows_per_tile=None, min_mxu_k=16):
        b, c, h, w = x.shape
        assert c == self.dim
        hw = h * w
        c2 = 2 * self.hidden

        vmem_phys = _vmem_capacity_bytes()
        vmem_limit = min(vmem_phys * 3 // 4, 96 * 1024 * 1024)

        if rows_per_tile is None:
            rows_per_tile = _pick_rows_per_tile(h, w, c2, vmem_limit // 3)
        if h % rows_per_tile:
            raise ValueError("rows_per_tile must divide H")
        thw = rows_per_tile * w
        if thw % 128 != 0 and thw != hw:
            raise ValueError("rows_per_tile*W must be a multiple of 128 (or the full plane)")
        n_tiles = h // rows_per_tile

        x3 = x.reshape(b, c, hw)   # free view; NO NCHW<->NHWC HBM transpose

        use_mxu_in = c >= min_mxu_k
        use_mxu_out = self.hidden >= min_mxu_k
        mxu_dtype = jnp.bfloat16 if x.dtype == jnp.bfloat16 else jnp.float32

        def cur_map(i, j):
            return (i, 0, j)

        def prev_map(i, j):
            return (i, 0, jnp.maximum(j - 1, 0))      # clamped; content zeroed at j==0

        def next_map(i, j):
            return (i, 0, jnp.minimum(j + 1, n_tiles - 1))

        def const2(i, j):
            return (0, 0)

        args = [x3, x3, x3, self.w_in, self.w_dw.reshape(c2, 9), self.w_out]
        in_specs = [
            pl.BlockSpec((1, c, thw), cur_map),
            pl.BlockSpec((1, c, thw), prev_map),
            pl.BlockSpec((1, c, thw), next_map),
            pl.BlockSpec((c2, c), const2),
            pl.BlockSpec((c2, 9), const2),
            pl.BlockSpec((c, self.hidden), const2),
        ]
        if self.has_bias:
            args += [self.b_in.reshape(c2, 1),
                     self.b_dw.reshape(c2, 1),
                     self.b_out.reshape(c, 1)]
            in_specs += [
                pl.BlockSpec((c2, 1), const2),
                pl.BlockSpec((c2, 1), const2),
                pl.BlockSpec((c, 1), const2),
            ]

        kernel = functools.partial(
            _ffn_kernel, hidden=self.hidden, W=w,
            rows_per_tile=rows_per_tile, n_row_tiles=n_tiles,
            has_bias=self.has_bias, use_mxu_in=use_mxu_in,
            use_mxu_out=use_mxu_out, mxu_dtype=mxu_dtype)

        y3 = pl.pallas_call(
            kernel,
            out_shape=jax.ShapeDtypeStruct((b, c, hw), x.dtype),
            grid_spec=pltpu.PrefetchScalarGridSpec(
                num_scalar_prefetch=0,
                grid=(b, n_tiles),
                in_specs=in_specs,
                out_specs=pl.BlockSpec((1, c, thw), cur_map),
            ),
            compiler_params=pltpu.CompilerParams(
                dimension_semantics=("parallel", "parallel"),
                vmem_limit_bytes=int(vmem_limit),
            ),
        )(*args)
        return y3.reshape(b, c, h, w)


def _reference(x, mod):
    """Pure-JAX/XLA reference of the PyTorch forward (exact erf gelu)."""
    b, c, h, w = x.shape
    hp = lax.Precision.HIGHEST
    xf = x.astype(jnp.float32)
    y = jnp.einsum('oc,bchw->bohw', mod.w_in, xf, precision=hp)
    if mod.has_bias:
        y = y + mod.b_in[None, :, None, None]
    yp = jnp.pad(y, ((0, 0), (0, 0), (1, 1), (1, 1)))
    z = jnp.zeros_like(y)
    for ki in range(3):
        for kj in range(3):
            z = z + mod.w_dw[None, :, ki, kj, None, None] * yp[:, :, ki:ki + h, kj:kj + w]
    if mod.has_bias:
        z = z + mod.b_dw[None, :, None, None]
    x1, x2 = z[:, :mod.hidden], z[:, mod.hidden:]
    g = 0.5 * x1 * (1.0 + jax.scipy.special.erf(x1 * _SQRT_HALF)) * x2
    out = jnp.einsum('oc,bchw->bohw', mod.w_out, g, precision=hp)
    if mod.has_bias:
        out = out + mod.b_out[None, :, None, None]
    return out.astype(x.dtype)


if __name__ == "__main__":
    key = jax.random.PRNGKey(0)
    kx, kp = jax.random.split(key)
    b, dim, h, w = 2, 4, 16, 16
    ffn_expansion_factor = 2.0
    x = jax.random.normal(kx, (b, dim, h, w), dtype=jnp.float32)

    ok = True
    for has_bias in (True, False):
        mod = FeedForwardPallas(dim, ffn_expansion_factor, has_bias, key=kp)
        ref = _reference(x, mod)
        # (a) multi-tile config: exercises the 1-row halo + VPU small-K matmul path
        out_a = jax.block_until_ready(mod(x, rows_per_tile=8))
        # (b) auto tiling + forced-MXU matmul path
        out_b = jax.block_until_ready(mod(x, min_mxu_k=0))
        for out in (out_a, out_b):
            if out.shape != (b, dim, h, w):
                ok = False
            if not jnp.allclose(out, ref, atol=2e-4, rtol=2e-4):
                ok = False

    # bf16 activation path (bf16 MXU operands, f32 accumulation) — looser tolerance.
    mod = FeedForwardPallas(dim, ffn_expansion_factor, True, key=kp)
    xb = x.astype(jnp.bfloat16)
    out_bf = jax.block_until_ready(mod(xb, rows_per_tile=8, min_mxu_k=0))
    ref_bf = _reference(xb, mod)
    if not jnp.allclose(out_bf.astype(jnp.float32), ref_bf.astype(jnp.float32),
                        atol=5e-2, rtol=5e-2):
        ok = False

    if ok:
        print("KERNEL_OK")
</pallas_src>

<mosaic_0001>
module attributes {stable_mosaic.version = 11 : i64} {
  func.func @_ffn_kernel(%arg0: i32, %arg1: i32, %arg2: memref<1x4x128xf32, #tpu.memory_space<vmem>>, %arg3: memref<1x4x128xf32, #tpu.memory_space<vmem>>, %arg4: memref<1x4x128xf32, #tpu.memory_space<vmem>>, %arg5: memref<16x4xf32, #tpu.memory_space<vmem>>, %arg6: memref<16x9xf32, #tpu.memory_space<vmem>>, %arg7: memref<4x8xf32, #tpu.memory_space<vmem>>, %arg8: memref<16x1xf32, #tpu.memory_space<vmem>>, %arg9: memref<16x1xf32, #tpu.memory_space<vmem>>, %arg10: memref<4x1xf32, #tpu.memory_space<vmem>>, %arg11: memref<1x4x128xf32, #tpu.memory_space<vmem>>) attributes {dimension_semantics = [#tpu.dimension_semantics<parallel>, #tpu.dimension_semantics<parallel>], iteration_bounds = array<i64: 2, 2>, scalar_prefetch = 0 : i64, scratch_operands = 0 : i64, tpu.core_type = #tpu.core_type<tc>, window_params = [{transform_indices = @transform_0, window_bounds = array<i64: 1, 4, 128>}, {transform_indices = @transform_1, window_bounds = array<i64: 1, 4, 128>}, {transform_indices = @transform_2, window_bounds = array<i64: 1, 4, 128>}, {pipeline_mode = #tpu.pipeline_mode<synchronous>, transform_indices = @transform_3, window_bounds = array<i64: 16, 4>}, {pipeline_mode = #tpu.pipeline_mode<synchronous>, transform_indices = @transform_4, window_bounds = array<i64: 16, 9>}, {pipeline_mode = #tpu.pipeline_mode<synchronous>, transform_indices = @transform_5, window_bounds = array<i64: 4, 8>}, {pipeline_mode = #tpu.pipeline_mode<synchronous>, transform_indices = @transform_6, window_bounds = array<i64: 16, 1>}, {pipeline_mode = #tpu.pipeline_mode<synchronous>, transform_indices = @transform_7, window_bounds = array<i64: 16, 1>}, {pipeline_mode = #tpu.pipeline_mode<synchronous>, transform_indices = @transform_8, window_bounds = array<i64: 4, 1>}, {transform_indices = @transform_9, window_bounds = array<i64: 1, 4, 128>}]} {
    %c0 = arith.constant 0 : index
    %c0_0 = arith.constant 0 : index
    %c0_1 = arith.constant 0 : index
    %0 = vector.load %arg2[%c0, %c0_0, %c0_1] : memref<1x4x128xf32, #tpu.memory_space<vmem>>, vector<1x4x128xf32>
    %1 = vector.shape_cast %0 : vector<1x4x128xf32> to vector<4x128xf32>
    %c0_2 = arith.constant 0 : index
    %c0_3 = arith.constant 0 : index
    %c0_4 = arith.constant 0 : index
    %2 = vector.load %arg3[%c0_2, %c0_3, %c0_4] : memref<1x4x128xf32, #tpu.memory_space<vmem>>, vector<1x4x128xf32>
    %3 = vector.shape_cast %2 : vector<1x4x128xf32> to vector<4x128xf32>
    %4 = vector.extract_strided_slice %3 {offsets = [0, 112], sizes = [4, 16], strides = [1, 1]} : vector<4x128xf32> to vector<4x16xf32>
    %c0_5 = arith.constant 0 : index
    %c0_6 = arith.constant 0 : index
    %c0_7 = arith.constant 0 : index
    %5 = vector.load %arg4[%c0_5, %c0_6, %c0_7] : memref<1x4x128xf32, #tpu.memory_space<vmem>>, vector<1x4x128xf32>
    %6 = vector.shape_cast %5 : vector<1x4x128xf32> to vector<4x128xf32>
    %7 = vector.extract_strided_slice %6 {offsets = [0, 0], sizes = [4, 16], strides = [1, 1]} : vector<4x128xf32> to vector<4x16xf32>
    %cst = arith.constant 0.000000e+00 : f32
    %8 = vector.broadcast %cst : f32 to vector<4x1xf32>
    %9 = tpu.concatenate %8, %4, %1, %7, %8 in 1 : vector<4x1xf32>, vector<4x16xf32>, vector<4x128xf32>, vector<4x16xf32>, vector<4x1xf32> -> vector<4x162xf32>
    %c0_8 = arith.constant 0 : index
    %c0_9 = arith.constant 0 : index
    %10 = vector.load %arg5[%c0_8, %c0_9] : memref<16x4xf32, #tpu.memory_space<vmem>>, vector<16x4xf32>
    %c0_10 = arith.constant 0 : index
    %c0_11 = arith.constant 0 : index
    %11 = vector.load %arg6[%c0_10, %c0_11] : memref<16x9xf32, #tpu.memory_space<vmem>>, vector<16x9xf32>
    %c0_12 = arith.constant 0 : index
    %c0_13 = arith.constant 0 : index
    %12 = vector.load %arg7[%c0_12, %c0_13] : memref<4x8xf32, #tpu.memory_space<vmem>>, vector<4x8xf32>
    %13 = vector.extract_strided_slice %10 {offsets = [0, 0], sizes = [16, 1], strides = [1, 1]} : vector<16x4xf32> to vector<16x1xf32>
    %14 = vector.extract_strided_slice %9 {offsets = [0, 0], sizes = [1, 162], strides = [1, 1]} : vector<4x162xf32> to vector<1x162xf32>
    %15 = vector.broadcast %13 : vector<16x1xf32> to vector<16x162xf32>
    %16 = vector.broadcast %14 : vector<1x162xf32> to vector<16x162xf32>
    %17 = arith.mulf %15, %16 : vector<16x162xf32>
    %18 = vector.extract_strided_slice %10 {offsets = [0, 1], sizes = [16, 1], strides = [1, 1]} : vector<16x4xf32> to vector<16x1xf32>
    %19 = vector.extract_strided_slice %9 {offsets = [1, 0], sizes = [1, 162], strides = [1, 1]} : vector<4x162xf32> to vector<1x162xf32>
    %20 = vector.broadcast %18 : vector<16x1xf32> to vector<16x162xf32>
    %21 = vector.broadcast %19 : vector<1x162xf32> to vector<16x162xf32>
    %22 = arith.mulf %20, %21 : vector<16x162xf32>
    %23 = arith.addf %17, %22 : vector<16x162xf32>
    %24 = vector.extract_strided_slice %10 {offsets = [0, 2], sizes = [16, 1], strides = [1, 1]} : vector<16x4xf32> to vector<16x1xf32>
    %25 = vector.extract_strided_slice %9 {offsets = [2, 0], sizes = [1, 162], strides = [1, 1]} : vector<4x162xf32> to vector<1x162xf32>
    %26 = vector.broadcast %24 : vector<16x1xf32> to vector<16x162xf32>
    %27 = vector.broadcast %25 : vector<1x162xf32> to vector<16x162xf32>
    %28 = arith.mulf %26, %27 : vector<16x162xf32>
    %29 = arith.addf %23, %28 : vector<16x162xf32>
    %30 = vector.extract_strided_slice %10 {offsets = [0, 3], sizes = [16, 1], strides = [1, 1]} : vector<16x4xf32> to vector<16x1xf32>
    %31 = vector.extract_strided_slice %9 {offsets = [3, 0], sizes = [1, 162], strides = [1, 1]} : vector<4x162xf32> to vector<1x162xf32>
    %32 = vector.broadcast %30 : vector<16x1xf32> to vector<16x162xf32>
    %33 = vector.broadcast %31 : vector<1x162xf32> to vector<16x162xf32>
    %34 = arith.mulf %32, %33 : vector<16x162xf32>
    %35 = arith.addf %29, %34 : vector<16x162xf32>
    %c0_14 = arith.constant 0 : index
    %c0_15 = arith.constant 0 : index
    %36 = vector.load %arg8[%c0_14, %c0_15] : memref<16x1xf32, #tpu.memory_space<vmem>>, vector<16x1xf32>
    %37 = vector.broadcast %36 : vector<16x1xf32> to vector<16x162xf32>
    %38 = arith.addf %35, %37 : vector<16x162xf32>
    %39 = tpu.iota {dimensions = array<i32: 1>} : vector<1x162xi32>
    %c16_i32 = arith.constant 16 : i32
    %40 = vector.broadcast %c16_i32 : i32 to vector<1x162xi32>
    %41 = arith.remsi %39, %40 : vector<1x162xi32>
    %c0_i32 = arith.constant 0 : i32
    %42 = arith.cmpi sgt, %arg1, %c0_i32 : i32
    %43 = arith.extui %42 : i1 to i32
    %44 = arith.sitofp %43 : i32 to f32
    %c1_i32 = arith.constant 1 : i32
    %45 = arith.cmpi slt, %arg1, %c1_i32 : i32
    %46 = arith.extui %45 : i1 to i32
    %47 = arith.sitofp %46 : i32 to f32
    %c1_i32_16 = arith.constant 1 : i32
    %48 = vector.broadcast %c1_i32_16 : i32 to vector<1x162xi32>
    %49 = arith.cmpi sge, %39, %48 : vector<1x162xi32>
    %c17_i32 = arith.constant 17 : i32
    %50 = vector.broadcast %c17_i32 : i32 to vector<1x162xi32>
    %51 = arith.cmpi slt, %39, %50 : vector<1x162xi32>
    %52 = arith.andi %49, %51 : vector<1x162xi1>
    %c145_i32 = arith.constant 145 : i32
    %53 = vector.broadcast %c145_i32 : i32 to vector<1x162xi32>
    %54 = arith.cmpi sge, %39, %53 : vector<1x162xi32>
    %c161_i32 = arith.constant 161 : i32
    %55 = vector.broadcast %c161_i32 : i32 to vector<1x162xi32>
    %56 = arith.cmpi slt, %39, %55 : vector<1x162xi32>
    %57 = arith.andi %54, %56 : vector<1x162xi1>
    %cst_17 = arith.constant 1.000000e+00 : f32
    %58 = vector.broadcast %47 : f32 to vector<1x162xf32>
    %59 = vector.broadcast %cst_17 : f32 to vector<1x162xf32>
    %60 = arith.select %57, %58, %59 : vector<1x162xi1>, vector<1x162xf32>
    %61 = vector.broadcast %44 : f32 to vector<1x162xf32>
    %62 = arith.select %52, %61, %60 : vector<1x162xi1>, vector<1x162xf32>
    %63 = vector.broadcast %62 : vector<1x162xf32> to vector<16x162xf32>
    %64 = arith.mulf %38, %63 : vector<16x162xf32>
    %c0_i32_18 = arith.constant 0 : i32
    %65 = vector.broadcast %c0_i32_18 : i32 to vector<1x162xi32>
    %66 = arith.cmpi ne, %41, %65 : vector<1x162xi32>
    %67 = arith.extui %66 : vector<1x162xi1> to vector<1x162xi32>
    %68 = arith.sitofp %67 : vector<1x162xi32> to vector<1x162xf32>
    %69 = vector.broadcast %68 : vector<1x162xf32> to vector<16x162xf32>
    %70 = arith.mulf %64, %69 : vector<16x162xf32>
    %c1_i32_19 = arith.constant 1 : i32
    %71 = vector.broadcast %c1_i32_19 : i32 to vector<1x162xi32>
    %72 = arith.cmpi ne, %41, %71 : vector<1x162xi32>
    %73 = arith.extui %72 : vector<1x162xi1> to vector<1x162xi32>
    %74 = arith.sitofp %73 : vector<1x162xi32> to vector<1x162xf32>
    %75 = vector.broadcast %74 : vector<1x162xf32> to vector<16x162xf32>
    %76 = arith.mulf %64, %75 : vector<16x162xf32>
    %77 = vector.extract_strided_slice %11 {offsets = [0, 0], sizes = [16, 1], strides = [1, 1]} : vector<16x9xf32> to vector<16x1xf32>
    %78 = vector.extract_strided_slice %70 {offsets = [0, 0], sizes = [16, 128], strides = [1, 1]} : vector<16x162xf32> to vector<16x128xf32>
    %79 = vector.broadcast %77 : vector<16x1xf32> to vector<16x128xf32>
    %80 = arith.mulf %79, %78 : vector<16x128xf32>
    %81 = vector.extract_strided_slice %11 {offsets = [0, 1], sizes = [16, 1], strides = [1, 1]} : vector<16x9xf32> to vector<16x1xf32>
    %82 = vector.extract_strided_slice %64 {offsets = [0, 1], sizes = [16, 128], strides = [1, 1]} : vector<16x162xf32> to vector<16x128xf32>
    %83 = vector.broadcast %81 : vector<16x1xf32> to vector<16x128xf32>
    %84 = arith.mulf %83, %82 : vector<16x128xf32>
    %85 = arith.addf %80, %84 : vector<16x128xf32>
    %86 = vector.extract_strided_slice %11 {offsets = [0, 2], sizes = [16, 1], strides = [1, 1]} : vector<16x9xf32> to vector<16x1xf32>
    %87 = vector.extract_strided_slice %76 {offsets = [0, 2], sizes = [16, 128], strides = [1, 1]} : vector<16x162xf32> to vector<16x128xf32>
    %88 = vector.broadcast %86 : vector<16x1xf32> to vector<16x128xf32>
    %89 = arith.mulf %88, %87 : vector<16x128xf32>
    %90 = arith.addf %85, %89 : vector<16x128xf32>
    %91 = vector.extract_strided_slice %11 {offsets = [0, 3], sizes = [16, 1], strides = [1, 1]} : vector<16x9xf32> to vector<16x1xf32>
    %92 = vector.extract_strided_slice %70 {offsets = [0, 16], sizes = [16, 128], strides = [1, 1]} : vector<16x162xf32> to vector<16x128xf32>
    %93 = vector.broadcast %91 : vector<16x1xf32> to vector<16x128xf32>
    %94 = arith.mulf %93, %92 : vector<16x128xf32>
    %95 = arith.addf %90, %94 : vector<16x128xf32>
    %96 = vector.extract_strided_slice %11 {offsets = [0, 4], sizes = [16, 1], strides = [1, 1]} : vector<16x9xf32> to vector<16x1xf32>
    %97 = vector.extract_strided_slice %64 {offsets = [0, 17], sizes = [16, 128], strides = [1, 1]} : vector<16x162xf32> to vector<16x128xf32>
    %98 = vector.broadcast %96 : vector<16x1xf32> to vector<16x128xf32>
    %99 = arith.mulf %98, %97 : vector<16x128xf32>
    %100 = arith.addf %95, %99 : vector<16x128xf32>
    %101 = vector.extract_strided_slice %11 {offsets = [0, 5], sizes = [16, 1], strides = [1, 1]} : vector<16x9xf32> to vector<16x1xf32>
    %102 = vector.extract_strided_slice %76 {offsets = [0, 18], sizes = [16, 128], strides = [1, 1]} : vector<16x162xf32> to vector<16x128xf32>
    %103 = vector.broadcast %101 : vector<16x1xf32> to vector<16x128xf32>
    %104 = arith.mulf %103, %102 : vector<16x128xf32>
    %105 = arith.addf %100, %104 : vector<16x128xf32>
    %106 = vector.extract_strided_slice %11 {offsets = [0, 6], sizes = [16, 1], strides = [1, 1]} : vector<16x9xf32> to vector<16x1xf32>
    %107 = vector.extract_strided_slice %70 {offsets = [0, 32], sizes = [16, 128], strides = [1, 1]} : vector<16x162xf32> to vector<16x128xf32>
    %108 = vector.broadcast %106 : vector<16x1xf32> to vector<16x128xf32>
    %109 = arith.mulf %108, %107 : vector<16x128xf32>
    %110 = arith.addf %105, %109 : vector<16x128xf32>
    %111 = vector.extract_strided_slice %11 {offsets = [0, 7], sizes = [16, 1], strides = [1, 1]} : vector<16x9xf32> to vector<16x1xf32>
    %112 = vector.extract_strided_slice %64 {offsets = [0, 33], sizes = [16, 128], strides = [1, 1]} : vector<16x162xf32> to vector<16x128xf32>
    %113 = vector.broadcast %111 : vector<16x1xf32> to vector<16x128xf32>
    %114 = arith.mulf %113, %112 : vector<16x128xf32>
    %115 = arith.addf %110, %114 : vector<16x128xf32>
    %116 = vector.extract_strided_slice %11 {offsets = [0, 8], sizes = [16, 1], strides = [1, 1]} : vector<16x9xf32> to vector<16x1xf32>
    %117 = vector.extract_strided_slice %76 {offsets = [0, 34], sizes = [16, 128], strides = [1, 1]} : vector<16x162xf32> to vector<16x128xf32>
    %118 = vector.broadcast %116 : vector<16x1xf32> to vector<16x128xf32>
    %119 = arith.mulf %118, %117 : vector<16x128xf32>
    %120 = arith.addf %115, %119 : vector<16x128xf32>
    %c0_20 = arith.constant 0 : index
    %c0_21 = arith.constant 0 : index
    %121 = vector.load %arg9[%c0_20, %c0_21] : memref<16x1xf32, #tpu.memory_space<vmem>>, vector<16x1xf32>
    %122 = vector.broadcast %121 : vector<16x1xf32> to vector<16x128xf32>
    %123 = arith.addf %120, %122 : vector<16x128xf32>
    %124 = vector.extract_strided_slice %123 {offsets = [0, 0], sizes = [8, 128], strides = [1, 1]} : vector<16x128xf32> to vector<8x128xf32>
    %125 = vector.extract_strided_slice %123 {offsets = [8, 0], sizes = [8, 128], strides = [1, 1]} : vector<16x128xf32> to vector<8x128xf32>
    %cst_22 = arith.constant 5.000000e-01 : f32
    %126 = vector.broadcast %cst_22 : f32 to vector<8x128xf32>
    %127 = arith.mulf %126, %124 : vector<8x128xf32>
    %cst_23 = arith.constant 0.707106769 : f32
    %128 = vector.broadcast %cst_23 : f32 to vector<8x128xf32>
    %129 = arith.mulf %124, %128 : vector<8x128xf32>
    %130 = math.absf %129 : vector<8x128xf32>
    %cst_24 = arith.constant 0.327591091 : f32
    %131 = vector.broadcast %cst_24 : f32 to vector<8x128xf32>
    %132 = arith.mulf %131, %130 : vector<8x128xf32>
    %cst_25 = arith.constant 1.000000e+00 : f32
    %133 = vector.broadcast %cst_25 : f32 to vector<8x128xf32>
    %134 = arith.addf %133, %132 : vector<8x128xf32>
    %135 = tpu.reciprocal %134 {approx = true} : vector<8x128xf32> -> vector<8x128xf32>
    %136 = arith.mulf %134, %135 : vector<8x128xf32>
    %cst_26 = arith.constant 2.000000e+00 : f32
    %137 = vector.broadcast %cst_26 : f32 to vector<8x128xf32>
    %138 = arith.subf %137, %136 : vector<8x128xf32>
    %139 = arith.mulf %135, %138 : vector<8x128xf32>
    %cst_27 = arith.constant 1.06140542 : f32
    %140 = vector.broadcast %cst_27 : f32 to vector<8x128xf32>
    %141 = arith.mulf %139, %140 : vector<8x128xf32>
    %cst_28 = arith.constant -1.45315206 : f32
    %142 = vector.broadcast %cst_28 : f32 to vector<8x128xf32>
    %143 = arith.addf %142, %141 : vector<8x128xf32>
    %144 = arith.mulf %139, %143 : vector<8x128xf32>
    %cst_29 = arith.constant 1.42141378 : f32
    %145 = vector.broadcast %cst_29 : f32 to vector<8x128xf32>
    %146 = arith.addf %145, %144 : vector<8x128xf32>
    %147 = arith.mulf %139, %146 : vector<8x128xf32>
    %cst_30 = arith.constant -0.284496725 : f32
    %148 = vector.broadcast %cst_30 : f32 to vector<8x128xf32>
    %149 = arith.addf %148, %147 : vector<8x128xf32>
    %150 = arith.mulf %139, %149 : vector<8x128xf32>
    %cst_31 = arith.constant 0.254829586 : f32
    %151 = vector.broadcast %cst_31 : f32 to vector<8x128xf32>
    %152 = arith.addf %151, %150 : vector<8x128xf32>
    %153 = arith.mulf %139, %152 : vector<8x128xf32>
    %cst_32 = arith.constant 0.000000e+00 : f32
    %154 = vector.broadcast %cst_32 : f32 to vector<8x128xf32>
    %155 = arith.subf %154, %130 : vector<8x128xf32>
    %156 = arith.mulf %155, %130 : vector<8x128xf32>
    %157 = math.exp %156 : vector<8x128xf32>
    %158 = arith.mulf %153, %157 : vector<8x128xf32>
    %cst_33 = arith.constant 1.000000e+00 : f32
    %159 = vector.broadcast %cst_33 : f32 to vector<8x128xf32>
    %160 = arith.subf %159, %158 : vector<8x128xf32>
    %cst_34 = arith.constant 0.000000e+00 : f32
    %161 = vector.broadcast %cst_34 : f32 to vector<8x128xf32>
    %162 = arith.cmpf oge, %129, %161 : vector<8x128xf32>
    %cst_35 = arith.constant 0.000000e+00 : f32
    %163 = vector.broadcast %cst_35 : f32 to vector<8x128xf32>
    %164 = arith.subf %163, %160 : vector<8x128xf32>
    %165 = arith.select %162, %160, %164 : vector<8x128xi1>, vector<8x128xf32>
    %cst_36 = arith.constant 1.000000e+00 : f32
    %166 = vector.broadcast %cst_36 : f32 to vector<8x128xf32>
    %167 = arith.addf %166, %165 : vector<8x128xf32>
    %168 = arith.mulf %127, %167 : vector<8x128xf32>
    %169 = arith.mulf %168, %125 : vector<8x128xf32>
    %170 = vector.extract_strided_slice %12 {offsets = [0, 0], sizes = [4, 1], strides = [1, 1]} : vector<4x8xf32> to vector<4x1xf32>
    %171 = vector.extract_strided_slice %169 {offsets = [0, 0], sizes = [1, 128], strides = [1, 1]} : vector<8x128xf32> to vector<1x128xf32>
    %172 = vector.broadcast %170 : vector<4x1xf32> to vector<4x128xf32>
    %173 = vector.broadcast %171 : vector<1x128xf32> to vector<4x128xf32>
    %174 = arith.mulf %172, %173 : vector<4x128xf32>
    %175 = vector.extract_strided_slice %12 {offsets = [0, 1], sizes = [4, 1], strides = [1, 1]} : vector<4x8xf32> to vector<4x1xf32>
    %176 = vector.extract_strided_slice %169 {offsets = [1, 0], sizes = [1, 128], strides = [1, 1]} : vector<8x128xf32> to vector<1x128xf32>
    %177 = vector.broadcast %175 : vector<4x1xf32> to vector<4x128xf32>
    %178 = vector.broadcast %176 : vector<1x128xf32> to vector<4x128xf32>
    %179 = arith.mulf %177, %178 : vector<4x128xf32>
    %180 = arith.addf %174, %179 : vector<4x128xf32>
    %181 = vector.extract_strided_slice %12 {offsets = [0, 2], sizes = [4, 1], strides = [1, 1]} : vector<4x8xf32> to vector<4x1xf32>
    %182 = vector.extract_strided_slice %169 {offsets = [2, 0], sizes = [1, 128], strides = [1, 1]} : vector<8x128xf32> to vector<1x128xf32>
    %183 = vector.broadcast %181 : vector<4x1xf32> to vector<4x128xf32>
    %184 = vector.broadcast %182 : vector<1x128xf32> to vector<4x128xf32>
    %185 = arith.mulf %183, %184 : vector<4x128xf32>
    %186 = arith.addf %180, %185 : vector<4x128xf32>
    %187 = vector.extract_strided_slice %12 {offsets = [0, 3], sizes = [4, 1], strides = [1, 1]} : vector<4x8xf32> to vector<4x1xf32>
    %188 = vector.extract_strided_slice %169 {offsets = [3, 0], sizes = [1, 128], strides = [1, 1]} : vector<8x128xf32> to vector<1x128xf32>
    %189 = vector.broadcast %187 : vector<4x1xf32> to vector<4x128xf32>
    %190 = vector.broadcast %188 : vector<1x128xf32> to vector<4x128xf32>
    %191 = arith.mulf %189, %190 : vector<4x128xf32>
    %192 = arith.addf %186, %191 : vector<4x128xf32>
    %193 = vector.extract_strided_slice %12 {offsets = [0, 4], sizes = [4, 1], strides = [1, 1]} : vector<4x8xf32> to vector<4x1xf32>
    %194 = vector.extract_strided_slice %169 {offsets = [4, 0], sizes = [1, 128], strides = [1, 1]} : vector<8x128xf32> to vector<1x128xf32>
    %195 = vector.broadcast %193 : vector<4x1xf32> to vector<4x128xf32>
    %196 = vector.broadcast %194 : vector<1x128xf32> to vector<4x128xf32>
    %197 = arith.mulf %195, %196 : vector<4x128xf32>
    %198 = arith.addf %192, %197 : vector<4x128xf32>
    %199 = vector.extract_strided_slice %12 {offsets = [0, 5], sizes = [4, 1], strides = [1, 1]} : vector<4x8xf32> to vector<4x1xf32>
    %200 = vector.extract_strided_slice %169 {offsets = [5, 0], sizes = [1, 128], strides = [1, 1]} : vector<8x128xf32> to vector<1x128xf32>
    %201 = vector.broadcast %199 : vector<4x1xf32> to vector<4x128xf32>
    %202 = vector.broadcast %200 : vector<1x128xf32> to vector<4x128xf32>
    %203 = arith.mulf %201, %202 : vector<4x128xf32>
    %204 = arith.addf %198, %203 : vector<4x128xf32>
    %205 = vector.extract_strided_slice %12 {offsets = [0, 6], sizes = [4, 1], strides = [1, 1]} : vector<4x8xf32> to vector<4x1xf32>
    %206 = vector.extract_strided_slice %169 {offsets = [6, 0], sizes = [1, 128], strides = [1, 1]} : vector<8x128xf32> to vector<1x128xf32>
    %207 = vector.broadcast %205 : vector<4x1xf32> to vector<4x128xf32>
    %208 = vector.broadcast %206 : vector<1x128xf32> to vector<4x128xf32>
    %209 = arith.mulf %207, %208 : vector<4x128xf32>
    %210 = arith.addf %204, %209 : vector<4x128xf32>
    %211 = vector.extract_strided_slice %12 {offsets = [0, 7], sizes = [4, 1], strides = [1, 1]} : vector<4x8xf32> to vector<4x1xf32>
    %212 = vector.extract_strided_slice %169 {offsets = [7, 0], sizes = [1, 128], strides = [1, 1]} : vector<8x128xf32> to vector<1x128xf32>
    %213 = vector.broadcast %211 : vector<4x1xf32> to vector<4x128xf32>
    %214 = vector.broadcast %212 : vector<1x128xf32> to vector<4x128xf32>
    %215 = arith.mulf %213, %214 : vector<4x128xf32>
    %216 = arith.addf %210, %215 : vector<4x128xf32>
    %c0_37 = arith.constant 0 : index
    %c0_38 = arith.constant 0 : index
    %217 = vector.load %arg10[%c0_37, %c0_38] : memref<4x1xf32, #tpu.memory_space<vmem>>, vector<4x1xf32>
    %218 = vector.broadcast %217 : vector<4x1xf32> to vector<4x128xf32>
    %219 = arith.addf %216, %218 : vector<4x128xf32>
    %c0_39 = arith.constant 0 : index
    %c0_40 = arith.constant 0 : index
    %c0_41 = arith.constant 0 : index
    %220 = vector.load %arg11[%c0_39, %c0_40, %c0_41] : memref<1x4x128xf32, #tpu.memory_space<vmem>>, vector<1x4x128xf32>
    %221 = vector.shape_cast %220 : vector<1x4x128xf32> to vector<4x128xf32>
    %222 = vector.shape_cast %219 : vector<4x128xf32> to vector<1x4x128xf32>
    tpu.vector_store %arg11[%c0_39, %c0_40, %c0_41], %222 {strides = array<i32>} : memref<1x4x128xf32, #tpu.memory_space<vmem>>, vector<1x4x128xf32>,
    return
  }
  func.func @transform_0(%arg0: i32, %arg1: i32) -> (i32, i32, i32) {
    %c0_i32 = arith.constant 0 : i32
    %c0_i32_0 = arith.constant 0 : i32
    return %arg0, %c0_i32, %arg1 : i32, i32, i32
  }
  func.func @transform_1(%arg0: i32, %arg1: i32) -> (i32, i32, i32) {
    %c1_i32 = arith.constant 1 : i32
    %0 = arith.subi %arg1, %c1_i32 : i32
    %c0_i32 = arith.constant 0 : i32
    %1 = arith.maxsi %0, %c0_i32 : i32
    %c0_i32_0 = arith.constant 0 : i32
    %c0_i32_1 = arith.constant 0 : i32
    return %arg0, %c0_i32_0, %1 : i32, i32, i32
  }
  func.func @transform_2(%arg0: i32, %arg1: i32) -> (i32, i32, i32) {
    %c1_i32 = arith.constant 1 : i32
    %0 = arith.addi %arg1, %c1_i32 : i32
    %c1_i32_0 = arith.constant 1 : i32
    %1 = arith.minsi %0, %c1_i32_0 : i32
    %c0_i32 = arith.constant 0 : i32
    %c0_i32_1 = arith.constant 0 : i32
    return %arg0, %c0_i32, %1 : i32, i32, i32
  }
  func.func @transform_3(%arg0: i32, %arg1: i32) -> (i32, i32) {
    %c0_i32 = arith.constant 0 : i32
    %c0_i32_0 = arith.constant 0 : i32
    %c0_i32_1 = arith.constant 0 : i32
    return %c0_i32, %c0_i32_0 : i32, i32
  }
  func.func @transform_4(%arg0: i32, %arg1: i32) -> (i32, i32) {
    %c0_i32 = arith.constant 0 : i32
    %c0_i32_0 = arith.constant 0 : i32
    %c0_i32_1 = arith.constant 0 : i32
    return %c0_i32, %c0_i32_0 : i32, i32
  }
  func.func @transform_5(%arg0: i32, %arg1: i32) -> (i32, i32) {
    %c0_i32 = arith.constant 0 : i32
    %c0_i32_0 = arith.constant 0 : i32
    %c0_i32_1 = arith.constant 0 : i32
    return %c0_i32, %c0_i32_0 : i32, i32
  }
  func.func @transform_6(%arg0: i32, %arg1: i32) -> (i32, i32) {
    %c0_i32 = arith.constant 0 : i32
    %c0_i32_0 = arith.constant 0 : i32
    %c0_i32_1 = arith.constant 0 : i32
    return %c0_i32, %c0_i32_0 : i32, i32
  }
  func.func @transform_7(%arg0: i32, %arg1: i32) -> (i32, i32) {
    %c0_i32 = arith.constant 0 : i32
    %c0_i32_0 = arith.constant 0 : i32
    %c0_i32_1 = arith.constant 0 : i32
    return %c0_i32, %c0_i32_0 : i32, i32
  }
  func.func @transform_8(%arg0: i32, %arg1: i32) -> (i32, i32) {
    %c0_i32 = arith.constant 0 : i32
    %c0_i32_0 = arith.constant 0 : i32
    %c0_i32_1 = arith.constant 0 : i32
    return %c0_i32, %c0_i32_0 : i32, i32
  }
  func.func @transform_9(%arg0: i32, %arg1: i32) -> (i32, i32, i32) {
    %c0_i32 = arith.constant 0 : i32
    %c0_i32_0 = arith.constant 0 : i32
    return %arg0, %c0_i32, %arg1 : i32, i32, i32
  }
}

</mosaic_0001>

<bundles_post_ra>
// kernel: tpu_custom_call.1
= control target key start
LH: loop header
LB: loop body
LE: loop exit
PB: predicated region body
PF: predicated region fallthrough
CT: control target
= control target key end

     0   :  { %s1899_s0 = inlined_call_operand.vmem [shape: f32[2,4,256], index: 0, kind: input, shape index: {}]   ;;  %s1900_s1 = inlined_call_operand.vmem [shape: f32[2,4,256], index: 1, kind: input, shape index: {}]   ;;  %s1901_s2 = inlined_call_operand.vmem [shape: f32[2,4,256], index: 2, kind: input, shape index: {}]   ;;  %s1902_s3 = inlined_call_operand.vmem [shape: f32[16,4], index: 3, kind: input, shape index: {}]   ;;  %s1903_s4 = inlined_call_operand.vmem [shape: f32[16,9], index: 4, kind: input, shape index: {}]   ;;  %s1904_s5 = inlined_call_operand.vmem [shape: f32[4,8], index: 5, kind: input, shape index: {}]   ;;  %s1905_s6 = inlined_call_operand.vmem [shape: f32[16,1], index: 6, kind: input, shape index: {}]   ;;  %s1906_s7 = inlined_call_operand.vmem [shape: f32[16,1], index: 7, kind: input, shape index: {}]   ;;  %s1907_s8 = inlined_call_operand.vmem [shape: f32[4,1], index: 8, kind: input, shape index: {}]   ;;  %s1908_s9 = inlined_call_operand.hbm [shape: f32[2,4,256], index: 9, kind: output, shape index: {}]  }
   0x1   :  { %1915 = sst [smem:[#allocation12_spill]] %s1899_s0 }
   0x2   :  { %14 = vsyncpa [#allocation3], 0 }
   0x3   :  { %16 = vsyncpa [#allocation3 + $0x1], 0  ;;  %s1514_s30 = smov 0   ;;  %s1516_s10 = smov 0  }
   0x4   :  { %s1518_s11 = smov 0   ;;  %s1520_s12 = smov 0  }
   0x5   :  { %s1522_s13 = smov 0   ;;  %s1524_s14 = smov 0  }
   0x6   :  { %s1526_s15 = smov 0   ;;  %s1528_s16 = smov 0  }
   0x7 LB: > { %1916 = sst [smem:[#allocation5_spill]] %s1422_s11  ;;  %s1184_s17 = sadd.s32 4294967295, %s1442_s16   ;;  %s1442_s16 = sphi %s1528_s16, %s22_s16   ;;  %s1438_s15 = sphi %s1526_s15, %s1933_s15   ;;  %s1434_s14 = sphi %s1524_s14, %s1932_s14   ;;  %s1430_s13 = sphi %s1522_s13, %s1931_s13   ;;  %s1426_s12 = sphi %s1520_s12, %s1930_s12   ;;  %s1422_s11 = sphi %s1518_s11, %s1936_s11   ;;  %s1418_s10 = sphi %s1516_s10, %s1935_s10   ;;  %s1414_s30 = sphi %s1514_s30, %s1934_s30  }
   0x8   : > { %1917 = sst [smem:[#allocation6_spill]] %s1434_s14  ;;  %s1185_s18 = sadd.s32 4294967294, %s1442_s16  }
   0x9   : > { %1918 = sst [smem:[#allocation7_spill]] %s1438_s15  ;;  %s31_s19 = sadd.s32 1, %s1434_s14 }
   0xa   : > { %p32_p0 = scmp.ge.s32.totalorder %s31_s19, 2  ;;  %s34_s20 = sadd.s32 1, %s1438_s15 }
   0xb   : > { %p275_p1 = scmp.ne.s32.totalorder %s1422_s11, %s1418_s10  ;;  %p276_p2 = scmp.eq.s32.totalorder %s1184_s17, 3 }
   0xc   : > { %s1938_s19 = smov (%p32_p0, %s31_s19), 0  ;;  %s1940_s20 = smov (!%p32_p0, %s34_s20), %s1438_s15 }
   0xd   : > { %1919 = sst [smem:[#allocation8_spill]] %s1938_s19  ;;  %s261_s21 = ssub.s32 %s1434_s14, %s1938_s19 }
   0xe   : > { %p1565_p3 = por %p276_p2, %p275_p1  ;;  %p36_p4 = scmp.ge.s32.totalorder %s1940_s20, 2 }
   0xf   : > { %p281_p5 = scmp.ne.s32.totalorder %s1418_s10, %s1414_s30  ;;  %p282_p6 = scmp.eq.s32.totalorder %s1185_s18, 3 }
  0x10   : > { %p1190_p7 = scmp.ge.s32.totalorder %s1442_s16, 1  ;;  %s1942_s20 = smov (%p36_p4, %s1940_s20), 0 }
  0x11   : > { %1921 = sst [smem:[#allocation9_spill]] %s1942_s20  ;;  %p1574_p8 = por %p282_p6, %p281_p5 }
  0x12   : > { %p363_p9 = scmp.lt.s32.totalorder %s1442_s16, 5  ;;  %s260_s24 = ssub.s32 %s1438_s15, %s1942_s20 }
  0x13   : > { %s1922_s23 = scalar_select %p1574_p8, 1, 0 }
  0x14   : > { %s265_s25 = sadd.s32 1, %s1422_s11  ;;  %s262_s26 = sor.u32 %s261_s21, %s260_s24 }
  0x15   : > { %1923 = sst [smem:[#allocation10_spill]] %s1922_s23  ;;  %p364_p10 = pnand %p1190_p7, %p363_p9 }
  0x16   : > { %p263_p11 = scmp.eq.s32.totalorder %s262_s26, 0  ;;  %v482_v0 = vld [vmem:[%s1902_s3] sm:$0xff] (!%p364_p10)  ;;  %p424_p12 = scmp.lt.s32.totalorder (!%p364_p10), %s1430_s13, 1  ;;  %v1444_v1 = vmov (!%p364_p10), 2   ;;  %v1445_v2 = vmov (!%p364_p10), 1   ;;  %v1446_v3 = vmov (!%p364_p10), 0   ;;  %v497_v19 = vlaneseq (!%p364_p10) }
  0x17   : > { %367 = sbr.rel (%p364_p10) target bundleno = 438 (0x1b6), region = 56  ;;  %p426_p13 = scmp.lt.s32.totalorder (!%p364_p10), %s1426_s12, 1  ;;  %1310 = vset.pattern.permute.xlu1 (!%p364_p10), %v1444_v1  ;;  %1308 = vset.pattern.permute.xlu0 (!%p364_p10), %v1445_v2  ;;  %v1447_v4 = vmov (!%p364_p10), 3   ;;  %v581_v7 = vld [vmem:[%s1905_s6] sm:$0xff] (!%p364_p10)  ;;  %v1449_v10 = vmov (!%p364_p10), 6   ;;  %v483_v11 = vld [vmem:[%s1902_s3 + $0x8] sm:$0xff] (!%p364_p10) }
  0x18   : > { %s1583_s27 = scalar_select %p263_p11, %s1422_s11, %s265_s25  }
  0x19   : > { %s446_s17 = sadd.s32 (!%p364_p10), 1, %s1426_s12  ;;  %534 = vperm.xlu1 (!%p364_p10), %1310, %v482_v0   ;;  %510 = vperm.xlu0 (!%p364_p10), %1308, %v482_v0   ;;  %s1194_s28 = sadd.s32 (!%p364_p10), 4294967295, %s1426_s12  ;;  %v484_v9 = vld [vmem:[%s1903_s4] sm:$0xff] (!%p364_p10)  ;;  %v1450_v12 = vmov (!%p364_p10), 4   ;;  %v1636_v13 = vld [vmem:[%s1903_s4 + $0x8] sm:$0xff] (!%p364_p10)  ;;  %v1451_v14 = vmov (!%p364_p10), 5  }
  0x1a   : > { %1924 = sst [smem:[#allocation11_spill]] %s1583_s27  ;;  %p1597_p0 = scmp.lt.s32.totalorder (!%p364_p10), %s446_s17, 1  ;;  %v1452_v15 = vmov (!%p364_p10), 7   ;;  %v1453_v16 = vmov (!%p364_p10), 8   ;;  %v922_v17 = vld [vmem:[%s1906_s7] sm:$0xff] (!%p364_p10)  ;;  %v582_v18 = vld [vmem:[%s1905_s6 + $0x8] sm:$0xff] (!%p364_p10) }
  0x1b   : > { %s1926_s0 = sld [smem:[#allocation12_spill]] (!%p364_p10)  ;;  %p433_p1 = scmp.gt.s32.totalorder (!%p364_p10), %s1194_s28, 0  ;;  %v1667_v22 = vshrl.u32 (!%p364_p10), %v497_v19, 7  ;;  %vm475_vm0 = vcmask (!%p364_p10), 7168   ;;  %vm477_vm1 = vcmask (!%p364_p10), 138240   ;;  %vm480_vm2 = vcmask (!%p364_p10), 269312  }
  0x1c   : > { %s1448_s15 = smov (!%p364_p10), 17   ;;  %p1195_p2 = scmp.lt.s32.totalorder (!%p364_p10), %s1194_s28, 1  ;;  %v598_v42 = vand.u32 (!%p364_p10), 127, %v497_v19  ;;  %vm698_vm13 = vcmask (!%p364_p10), 1039360   ;;  %vm729_vm14 = vcmask (!%p364_p10), 1031168   ;;  %vm760_vm15 = vcmask (!%p364_p10), 916480  }
  0x1d   : > { %1309 = vset.pattern.permute.xlu0 (!%p364_p10), %v1446_v3  ;;  %1311 = vset.pattern.permute.xlu1 (!%p364_p10), %v1447_v4  ;;  %v1670_v25 = vsub.s32 (!%p364_p10), 0, %v1667_v22  ;;  %v1673_v26 = vsub.s32 (!%p364_p10), 1, %v1667_v22  ;;  %v1688_v37 = vsub.s32 (!%p364_p10), 2, %v1667_v22  ;;  %p614_p4 = scmp.gt.s32.totalorder (!%p364_p10), %s1426_s12, 0  ;;  %v1704_v47 = vsub.s32 (!%p364_p10), 3, %v1667_v22  ;;  %s1461_s14 = smov (!%p364_p10), 94  }
  0x1e   : > { %s425_s18 = scalar_select %p424_p12, %s1430_s13, 1  ;;  %489 = vperm.xlu0 %1309, %v482_v0   ;;  %v1706_v48 = vadd.s32 128, %v598_v42  ;;  %vm620_vm3 = vcmp.ge.s32.totalorder %v598_v42, 1  ;;  %vm622_vm4 = vcmp.lt.s32.totalorder %v598_v42, 17 }
  0x1f   : > { %s427_s21 = scalar_select %p426_p13, %s1426_s12, 1  ;;  %vm624_vm7 = vmand %vm620_vm3, %vm622_vm4  ;;  %vm884_vm3 = vcmask 777216   ;;  %vm915_vm4 = vcmask 769024  }
  0x20   : > { %s1192_s24 = sshll.u32 %s425_s18, 1  ;;  %s1944_s17 = smov (!%p1597_p0, %s446_s17), 1  ;;  %vm627_vm5 = vcmp.ge.s32.totalorder %v1706_v48, 145  ;;  %vm629_vm6 = vcmp.lt.s32.totalorder %v1706_v48, 161 }
  0x21   : > { %s429_s26 = sadd.s32 %s1192_s24, %s427_s21  ;;  %s1946_s17 = smov (!%p1597_p0, %s1944_s17), 1  ;;  %vm631_vm8 = vmand %vm627_vm5, %vm629_vm6 }
  0x22   : > { %s1193_s29 = sshll.u32 %s429_s26, 2  ;;  %s1948_s28 = smov (!%p433_p1, %s1194_s28), 0 }
  0x23   : > { %s431_s18 = scalar_lea.vmem %s1926_s0, %s1193_s29  ;;  %s454_s21 = sadd.s32 %s1192_s24, %s1946_s17 }
  0x24   : > { %v460_v5 = vld [vmem:[%s431_s18] sm:$0xf]  ;;  %s1206_s26 = sshll.u32 %s454_s21, 2  ;;  %s1950_s28 = smov (!%p1195_p2, %s1948_s28), 1 }
  0x25   : > { %468 = vrot.lane.b32.xlu1 %v460_v5, %s1448_s15  ;;  %s456_s11 = scalar_lea.vmem %s1901_s2, %s1206_s26  ;;  %s440_s19 = sadd.s32 %s1950_s28, %s1192_s24 }
  0x26   : > { %v462_v6 = vld [vmem:[%s456_s11] sm:$0xf]  ;;  %s1201_s18 = sshll.u32 %s440_s19, 2  ;;  %s1457_s17 = smov 112  }
  0x27   : > { %472 = vrot.lane.b32.xlu0 %v462_v6, %s1448_s15  ;;  %s442_s25 = scalar_lea.vmem %s1900_s1, %s1201_s18  ;;  %s1454_s18 = smov 127  }
  0x28   : > { %v461_v8 = vld [vmem:[%s442_s25] sm:$0xf]  ;;  %s615_s26 = scalar_select %p614_p4, 1, 0 }
  0x29   : > { %464 = vrot.lane.b32.xlu1 %v461_v8, %s1448_s15  ;;  %s618_s19 = scalar_select %p426_p13, 1, 0  ;;  %v604_v8 = vand.u32 15, %v598_v42 }
  0x2a   : > { %s616_s20 = scvt.s32.f32 %s615_s26  ;;  %s1456_s25 = smov 111  }
  0x2b   : > { %585 = vperm.xlu0 %1309, %v581_v7   ;;  %s619_s29 = scvt.s32.f32 %s618_s19  ;;  %vm642_vm9 = vcmp.ne.s32.totalorder %v604_v8, 0  ;;  %vm652_vm10 = vcmp.ne.s32.totalorder %v604_v8, 1  ;;  %s1458_s21 = smov 110  }
  0x2c   : > { %v635_v56 = vstv %s616_s20  ;;  %s1459_s0 = smov 95   ;;  %s1460_s11 = smov 96  }
  0x2d   : > { %558 = vperm.xlu1 %1311, %v482_v0   ;;  %v632_v59 = vstv %s619_s29  ;;  %v1720_v63 = vsel %vm624_vm7, %v635_v56, 1.0  ;;  %s1462_s15 = smov 126   ;;  %s421_s20 = sand.u32 1, %s1418_s10  }
  0x2e   : > { %v1722_v7 = vsel %vm631_vm8, %v632_v59, 1.0  ;;  %s1191_s29 = sshll.u32 %s421_s20, 2  ;;  %s1463_s23 = smov [#allocation2]  }
  0x2f   : > { %1314 = vset.pattern.permute.xlu0 %v1447_v4  ;;  %s1352_s27 = sshll.u32 %s1463_s23, 4  ;;  %s1353_s27 = int_to_ptr.vmem [resolvable:$false] %s1352_s27 }
  0x30   : > { %737 = vperm.xlu0 %1314, %v484_v9   ;;  %s1354_s24 = scalar_lea.vmem %s1353_s27, 128 }
  0x31   : > { %1312 = vset.pattern.permute.xlu1 %v1445_v2 }
  0x32   : > { %675 = vperm.xlu1 %1312, %v484_v9  }
  0x34   : > { %1317 = vset.pattern.permute.xlu0 %v1449_v10 }
  0x35   : > { %830 = vperm.xlu0 %1317, %v484_v9  }
  0x36   : > { %1313 = vset.pattern.permute.xlu1 %v1444_v1 }
  0x37   : > { %706 = vperm.xlu1 %1313, %v484_v9  }
  0x39   : > { %1320 = vset.pattern.permute.xlu0 %v1446_v3 }
  0x3a   : > { %494 = vperm.xlu0 %1320, %v483_v11  }
  0x3b   : > { %1315 = vset.pattern.permute.xlu1 %v1450_v12 }
  0x3c   : > { %768 = vperm.xlu1 %1315, %v484_v9  }
  0x3e   : > { %1323 = vset.pattern.permute.xlu0 %v1447_v4 }
  0x3f   : > { %562 = vperm.xlu0 %1323, %v483_v11  }
  0x40   : > { %1316 = vset.pattern.permute.xlu1 %v1451_v14 }
  0x41   : > { %799 = vperm.xlu1 %1316, %v484_v9  }
  0x43   : > { %1326 = vset.pattern.permute.xlu0 %v1444_v1 }
  0x44   : > { %710 = vperm.xlu0 %1326, %v1636_v13  }
  0x45   : > { %1318 = vset.pattern.permute.xlu1 %v1452_v15 }
  0x46   : > { %861 = vperm.xlu1 %1318, %v484_v9  }
  0x48   : > { %1329 = vset.pattern.permute.xlu0 %v1450_v12 }
  0x49   : > { %772 = vperm.xlu0 %1329, %v1636_v13  }
  0x4a   : > { %1319 = vset.pattern.permute.xlu1 %v1453_v16 }
  0x4b   : > { %892 = vperm.xlu1 %1319, %v484_v9  }
  0x4d   : > { %1332 = vset.pattern.permute.xlu0 %v1452_v15 }
  0x4e   : > { %865 = vperm.xlu0 %1332, %v1636_v13  }
  0x4f   : > { %1321 = vset.pattern.permute.xlu1 %v1445_v2 }
  0x50   : > { %514 = vperm.xlu1 %1321, %v483_v11  }
  0x52   : > { %1333 = vset.pattern.permute.xlu0 %v1453_v16 }
  0x53   : > { %896 = vperm.xlu0 %1333, %v1636_v13  }
  0x54   : > { %1322 = vset.pattern.permute.xlu1 %v1444_v1 }
  0x55   : > { %538 = vperm.xlu1 %1322, %v483_v11  }
  0x57   : > { %1334 = vset.pattern.permute.xlu0 %v1446_v3 }
  0x58   : > { %926 = vperm.xlu0 %1334, %v922_v17  }
  0x59   : > { %1324 = vset.pattern.permute.xlu1 %v1446_v3 }
  0x5a   : > { %590 = vperm.xlu1 %1324, %v582_v18   ;;  %v1455_v18 = vmov 0.0  }
  0x5b   : > { %v1727_v19 = vsel %vm642_vm9, 1.0, %v1455_v18 }
  0x5e   : > { %1325 = vset.pattern.permute.xlu1 %v1445_v2 }
  0x5f   : > { %679 = vperm.xlu1 %1325, %v1636_v13  }
  0x63   : > { %1327 = vset.pattern.permute.xlu1 %v1447_v4 }
  0x64   : > { %741 = vperm.xlu1 %1327, %v1636_v13  }
  0x68   : > { %1328 = vset.pattern.permute.xlu1 %v1446_v3 }
  0x69   : > { %664 = vperm.xlu1 %1328, %v484_v9  }
  0x6d   : > { %1330 = vset.pattern.permute.xlu1 %v1451_v14 }
  0x6e   : > { %803 = vperm.xlu1 %1330, %v1636_v13  }
  0x72   : > { %1331 = vset.pattern.permute.xlu1 %v1449_v10 }
  0x73   : > { %834 = vperm.xlu1 %1331, %v1636_v13  }
  0x77   : > { %1335 = vset.pattern.permute.xlu1 %v1446_v3 }
  0x98   : > { %v535_v20 = vpop.permute.xlu1 %534  ;;  %v511_v21 = vpop.permute.xlu0 %510 }
  0x9c   : > { %v469_v23 = vpop.permute.xlu1 %468 }
  0x9d   : > { %v490_v24 = vpop.permute.xlu0 %489 }
  0xa0   : > { %v465_v27 = vpop.permute.xlu1 %464 }
  0xa1   : > { %v476_v28 = vsel %vm475_vm0, 0.0, %v465_v27  ;;  %v473_v29 = vpop.permute.xlu0 %472  ;;  %vm791_vm0 = vcmask 908288  }
  0xa2   : > { %v478_v30 = vsel %vm477_vm1, %v476_v28, %v469_v23  ;;  %v479_v31 = vsel %vm477_vm1, %v469_v23, %v473_v29  ;;  %v1734_v29 = vsel %vm652_vm10, 1.0, %v1455_v18  ;;  %vm822_vm1 = vcmask 900096  }
  0xa3   : > { %v1676_v32 = vrot.slane %v478_v30, %v1670_v25  ;;  %v1679_v33 = vrot.slane %v478_v30, %v1673_v26  ;;  %v481_v34 = vsel %vm480_vm2, %v479_v31, 0.0  ;;  %v1696_v43 = vrot.slane %v478_v30, %v1688_v37 }
  0xa4   : > { %v1682_v35 = vrot.slane %v481_v34, %v1670_v25  ;;  %v1685_v36 = vrot.slane %v481_v34, %v1673_v26  ;;  %v1699_v44 = vrot.slane %v481_v34, %v1688_v37  ;;  %v1711_v53 = vrot.slane %v478_v30, %v1704_v47 }
  0xa5   : > { %v505_v38 = vmul.f32 %v1676_v32, %v490_v24  ;;  %v525_v39 = vmul.f32 %v1679_v33, %v511_v21  ;;  %v549_v49 = vmul.f32 %v1696_v43, %v535_v20  ;;  %v1714_v54 = vrot.slane %v481_v34, %v1704_v47 }
  0xa6   : > { %v506_v40 = vmul.f32 %v1682_v35, %v490_v24  ;;  %v526_v41 = vmul.f32 %v1685_v36, %v511_v21  ;;  %v550_v50 = vmul.f32 %v1699_v44, %v535_v20  ;;  %vm853_vm2 = vcmask 785408  }
  0xa7   : > { %v529_v45 = vadd.f32 %v525_v39, %v505_v38  ;;  %v611_v38 = vand.u32 15, %v1706_v48 }
  0xa8   : > { %v530_v46 = vadd.f32 %v526_v41, %v506_v40 }
  0xa9   : > { %v553_v51 = vadd.f32 %v549_v49, %v529_v45  ;;  %vm653_vm11 = vcmp.ne.s32.totalorder %v611_v38, 1  ;;  %vm643_vm12 = vcmp.ne.s32.totalorder %v611_v38, 0 }
  0xaa   : > { %v554_v52 = vadd.f32 %v550_v50, %v530_v46  ;;  %v586_v62 = vpop.permute.xlu0 %585  ;;  %v1210_v50 = vsel %vm653_vm11, 1.0, %v1455_v18  ;;  %v1208_v56 = vsel %vm643_vm12, 1.0, %v1455_v18 }
  0xac   : > { %v559_v55 = vpop.permute.xlu1 %558 }
  0xad   : > { %v573_v57 = vmul.f32 %v1711_v53, %v559_v55  ;;  %v574_v58 = vmul.f32 %v1714_v54, %v559_v55 }
  0xaf   : > { %v577_v60 = vadd.f32 %v573_v57, %v553_v51  ;;  %v578_v61 = vadd.f32 %v574_v58, %v554_v52  ;;  %v738_v28 = vpop.permute.xlu0 %737 }
  0xb1   : > { %v593_v0 = vadd.f32 %v586_v62, %v577_v60  ;;  %v594_v5 = vadd.f32 %v586_v62, %v578_v61  ;;  %v676_v6 = vpop.permute.xlu1 %675 }
  0xb3   : > { %v638_v9 = vmul.f32 %v1720_v63, %v593_v0  ;;  %v639_v11 = vmul.f32 %v1722_v7, %v594_v5 }
  0xb4   : > { %v831_v42 = vpop.permute.xlu0 %830 }
  0xb5   : > { %v682_v16 = vmul.f32 %v676_v6, %v638_v9  ;;  %v683_v20 = vmul.f32 %v676_v6, %v639_v11  ;;  %v1731_v23 = vmul.f32 %v1727_v19, %v638_v9  ;;  %v658_v34 = vmul.f32 %v1734_v29, %v638_v9 }
  0xb6   : > { %v707_v17 = vpop.permute.xlu1 %706  ;;  %v659_v51 = vmul.f32 %v1210_v50, %v639_v11  ;;  %v649_v60 = vmul.f32 %v1208_v56, %v639_v11 }
  0xb7   : > { %690 = vrot.lane.b32.xlu1 %v682_v16, %s1454_s18  ;;  %v744_v30 = vmul.f32 %v738_v28, %v1731_v23  ;;  %v837_v45 = vmul.f32 %v831_v42, %v1731_v23  ;;  %v713_v52 = vmul.f32 %v707_v17, %v658_v34 }
  0xb8   : > { %v714_v61 = vmul.f32 %v707_v17, %v659_v51  ;;  %v745_v18 = vmul.f32 %v738_v28, %v649_v60 }
  0xb9   : > { %v495_v55 = vpop.permute.xlu0 %494 }
  0xba   : > { %v507_v62 = vmul.f32 %v1676_v32, %v495_v55  ;;  %v508_v0 = vmul.f32 %v1682_v35, %v495_v55 }
  0xbb   : > { %v769_v21 = vpop.permute.xlu1 %768  ;;  %692 = vrot.lane.b32.xlu1 %v683_v20, %s1454_s18 }
  0xbc   : > { %v775_v24 = vmul.f32 %v769_v21, %v638_v9  ;;  %v776_v27 = vmul.f32 %v769_v21, %v639_v11 }
  0xbe   : > { %783 = vrot.lane.b32.xlu0 %v775_v24, %s1456_s25  ;;  %v563_v5 = vpop.permute.xlu0 %562 }
  0xbf   : > { %785 = vrot.lane.b32.xlu1 %v776_v27, %s1456_s25 }
  0xc0   : > { %v800_v31 = vpop.permute.xlu1 %799 }
  0xc1   : > { %v806_v39 = vmul.f32 %v800_v31, %v658_v34  ;;  %v807_v20 = vmul.f32 %v800_v31, %v659_v51 }
  0xc2   : > { %752 = vrot.lane.b32.xlu0 %v744_v30, %s1457_s17 }
  0xc3   : > { %v711_v21 = vpop.permute.xlu0 %710 }
  0xc5   : > { %v862_v40 = vpop.permute.xlu1 %861 }
  0xc6   : > { %v868_v41 = vmul.f32 %v862_v40, %v638_v9  ;;  %814 = vrot.lane.b32.xlu0 %v806_v39, %s1458_s21  ;;  %v869_v46 = vmul.f32 %v862_v40, %v639_v11 }
  0xc8   : > { %876 = vrot.lane.b32.xlu1 %v868_v41, %s1459_s0 }
  0xca   : > { %845 = vrot.lane.b32.xlu0 %v837_v45, %s1460_s11  ;;  %v893_v49 = vpop.permute.xlu1 %892 }
  0xcb   : > { %v899_v48 = vmul.f32 %v893_v49, %v658_v34  ;;  %v773_v34 = vpop.permute.xlu0 %772 }
  0xcc   : > { %878 = vrot.lane.b32.xlu1 %v869_v46, %s1459_s0 }
  0xce   : > { %907 = vrot.lane.b32.xlu0 %v899_v48, %s1461_s14 }
  0xcf   : > { %v515_v57 = vpop.permute.xlu1 %514  ;;  %v866_v40 = vpop.permute.xlu0 %865 }
  0xd0   : > { %721 = vrot.lane.b32.xlu1 %v713_v52, %s1462_s15  ;;  %v527_v58 = vmul.f32 %v1679_v33, %v515_v57  ;;  %v528_v59 = vmul.f32 %v1685_v36, %v515_v57  ;;  %v576_v36 = vmul.f32 %v1714_v54, %v563_v5 }
  0xd2   : > { %669 = vperm.xlu0 %1334, %v1636_v13   ;;  %v531_v8 = vadd.f32 %v527_v58, %v507_v62  ;;  %v532_v9 = vadd.f32 %v528_v59, %v508_v0  ;;  %v575_v13 = vmul.f32 %v1711_v53, %v563_v5  ;;  %v900_v53 = vmul.f32 %v893_v49, %v659_v51  ;;  %v923_v51 = vld [vmem:[%s1906_s7 + $0x8] sm:$0xff] }
  0xd4   : > { %723 = vrot.lane.b32.xlu1 %v714_v61, %s1462_s15  ;;  %v539_v6 = vpop.permute.xlu1 %538 }
  0xd5   : > { %v551_v16 = vmul.f32 %v1696_v43, %v539_v6  ;;  %v552_v33 = vmul.f32 %v1699_v44, %v539_v6  ;;  %v838_v44 = vmul.f32 %v831_v42, %v649_v60  ;;  %v897_v60 = vpop.permute.xlu0 %896  ;;  %v1046_v6 = vld [vmem:[%s1907_s8] sm:$0xf] }
  0xd7   : > { %v555_v11 = vadd.f32 %v551_v16, %v531_v8  ;;  %v556_v17 = vadd.f32 %v552_v33, %v532_v9 }
  0xd8   : > { %754 = vrot.lane.b32.xlu1 %v745_v18, %s1457_s17 }
  0xd9   : > { %v580_v32 = vadd.f32 %v576_v36, %v556_v17  ;;  %v591_v35 = vpop.permute.xlu1 %590  ;;  %v579_v24 = vadd.f32 %v575_v13, %v555_v11  ;;  %v927_v8 = vpop.permute.xlu0 %926 }
  0xdb   : > { %v596_v27 = vadd.f32 %v591_v35, %v580_v32  ;;  %v595_v28 = vadd.f32 %v591_v35, %v579_v24 }
  0xdc   : > { %816 = vrot.lane.b32.xlu1 %v807_v20, %s1458_s21 }
  0xdd   : > { %v641_v43 = vmul.f32 %v1722_v7, %v596_v27  ;;  %v640_v38 = vmul.f32 %v1720_v63, %v595_v28 }
  0xde   : > { %v680_v30 = vpop.permute.xlu1 %679 }
  0xdf   : > { %v685_v54 = vmul.f32 %v680_v30, %v641_v43  ;;  %v778_v39 = vmul.f32 %v773_v34, %v641_v43  ;;  %v684_v7 = vmul.f32 %v680_v30, %v640_v38  ;;  %v870_v41 = vmul.f32 %v866_v40, %v640_v38 }
  0xe0   : > { %847 = vrot.lane.b32.xlu1 %v838_v44, %s1460_s11  ;;  %v661_v42 = vmul.f32 %v1210_v50, %v641_v43  ;;  %v777_v49 = vmul.f32 %v773_v34, %v640_v38  ;;  %v651_v48 = vmul.f32 %v1208_v56, %v641_v43  ;;  %v660_v55 = vmul.f32 %v1734_v29, %v640_v38 }
  0xe1   : > { %696 = vrot.lane.b32.xlu0 %v685_v54, %s1454_s18  ;;  %v1782_v61 = vmul.f32 %v1727_v19, %v640_v38 }
  0xe2   : > { %v716_v63 = vmul.f32 %v711_v21, %v661_v42  ;;  %v715_v56 = vmul.f32 %v711_v21, %v660_v55  ;;  %v901_v62 = vmul.f32 %v897_v60, %v660_v55  ;;  %v902_v5 = vmul.f32 %v897_v60, %v661_v42 }
  0xe3   : > { %v742_v31 = vpop.permute.xlu1 %741 }
  0xe4   : > { %909 = vrot.lane.b32.xlu1 %v900_v53, %s1461_s14  ;;  %v747_v52 = vmul.f32 %v742_v31, %v651_v48  ;;  %v746_v29 = vmul.f32 %v742_v31, %v1782_v61 }
  0xe5   : > { %789 = vrot.lane.b32.xlu0 %v778_v39, %s1456_s25 }
  0xe8   : > { %694 = vrot.lane.b32.xlu1 %v684_v7, %s1454_s18  ;;  %v665_v45 = vpop.permute.xlu1 %664  ;;  %s1212_s18 = sshll.u32 %s1430_s13, 1 }
  0xe9   : > { %v1768_v46 = vmul.f32 %v665_v45, %v1731_v23  ;;  %880 = vrot.lane.b32.xlu0 %v870_v41, %s1459_s0  ;;  %v871_v23 = vmul.f32 %v866_v40, %v641_v43 }
  0xec   : > { %787 = vrot.lane.b32.xlu1 %v777_v49, %s1456_s25  ;;  %s1066_s25 = sadd.s32 %s1426_s12, %s1212_s18  ;;  %s1055_s12 = scalar_lea.sflag [#allocation3], %s421_s20 }
  0xed   : > { %727 = vrot.lane.b32.xlu0 %v716_v63, %s1462_s15  ;;  %v804_v50 = vpop.permute.xlu1 %803 }
  0xee   : > { %v809_v57 = vmul.f32 %v804_v50, %v661_v42  ;;  %v808_v0 = vmul.f32 %v804_v50, %v660_v55 }
  0xf0   : > { %931 = vperm.xlu1 %1335, %v923_v51  }
  0xf1   : > { %758 = vrot.lane.b32.xlu0 %v747_v52, %s1457_s17 }
  0xf2   : > { %v835_v58 = vpop.permute.xlu1 %834 }
  0xf3   : > { %v840_v59 = vmul.f32 %v835_v58, %v651_v48  ;;  %v839_v19 = vmul.f32 %v835_v58, %v1782_v61 }
  0xf4   : > { %882 = vrot.lane.b32.xlu1 %v871_v23, %s1459_s0 }
  0xf5   : > { %820 = vrot.lane.b32.xlu0 %v809_v57, %s1458_s21  ;;  %1336 = vset.pattern.permute.xlu1 %v1445_v2  ;;  %v486_v2 = vld [vmem:[%s1904_s5] sm:$0xf] }
  0xf8   : > { %725 = vrot.lane.b32.xlu1 %v715_v56, %s1462_s15 }
  0xf9   : > { %851 = vrot.lane.b32.xlu0 %v840_v59, %s1460_s11 }
  0xfc   : > { %756 = vrot.lane.b32.xlu1 %v746_v29, %s1457_s17  ;;  %s1213_s17 = sshll.u32 %s1066_s25, 6 }
  0xfd   : > { %911 = vrot.lane.b32.xlu0 %v901_v62, %s1461_s14  ;;  %s1846_s13 = scalar_lea.hbm %s1908_s9, %s1213_s17 }
 0x100   : > { %818 = vrot.lane.b32.xlu1 %v808_v0, %s1458_s21  ;;  %s423_s21 = scalar_lea.vmem [#allocation2], %s1191_s29 }
 0x101   : > { %968 = vperm.xlu0 %1334, %v486_v2   ;;  %s1070_s0 = sshll.u32 %s423_s21, 4  ;;  %s1848_s0 = int_to_ptr.vmem [resolvable:$true] %s1070_s0 }
 0x102   : > { %s1348_s15 = scalar_lea.vmem %s1848_s0, 64  ;;  %p1355_p9 = scmp.lt.s32.totalorder %s1848_s0, %s1353_s27 }
 0x103   : > { %p1349_p5 = scmp.ne.s32.totalorder %s1848_s0, %s1348_s15  ;;  %p1356_p10 = scmp.lt.s32.totalorder %s1354_s24, %s1348_s15 }
 0x104   : > { %849 = vrot.lane.b32.xlu1 %v839_v19, %s1460_s11 }
 0x105   : > { %1337 = vset.pattern.permute.xlu0 %v1444_v1  ;;  %p1350_p6 = pnand %p1349_p5, %p1565_p3  ;;  %p1357_p11 = por %p1356_p10, %p1355_p9 }
 0x106   : > { %987 = vperm.xlu0 %1337, %v486_v2  }
 0x107   : > { %p1351_p7 = pneg %p1350_p6 }
 0x108   : > { %913 = vrot.lane.b32.xlu1 %v902_v5, %s1461_s14 }
 0x109   : > { %p1358_p12 = pnand %p1357_p11, %p1351_p7 }
 0x10a   : > { %1340 = vset.pattern.permute.xlu0 %v1451_v14 }
 0x10b   : > { %1017 = vperm.xlu0 %1340, %v486_v2  }
 0x10c   : > { %977 = vperm.xlu1 %1336, %v486_v2  }
 0x10f   : > { %1343 = vset.pattern.permute.xlu0 %v1446_v3 }
 0x110   : > { %1338 = vset.pattern.permute.xlu1 %v1447_v4  ;;  %1049 = vperm.xlu0 %1343, %v1046_v6  }
 0x111   : > { %997 = vperm.xlu1 %1338, %v486_v2  }
 0x115   : > { %1339 = vset.pattern.permute.xlu1 %v1450_v12 }
 0x116   : > { %1007 = vperm.xlu1 %1339, %v486_v2  }
 0x11a   : > { %1341 = vset.pattern.permute.xlu1 %v1449_v10 }
 0x11b   : > { %1027 = vperm.xlu1 %1341, %v486_v2  }
 0x11f   : > { %1342 = vset.pattern.permute.xlu1 %v1452_v15 }
 0x120   : > { %1037 = vperm.xlu1 %1342, %v486_v2  }
 0x129   : > { %v691_v1 = vpop.permute.xlu1 %690 }
 0x12d   : > { %v693_v14 = vpop.permute.xlu1 %692 }
 0x12e   : > { %v699_v12 = vsel %vm698_vm13, %v691_v1, %v693_v14 }
 0x12f   : > { %v703_v11 = vadd.f32 %v699_v12, %v1768_v46 }
 0x130   : > { %v784_v33 = vpop.permute.xlu0 %783 }
 0x131   : > { %v786_v9 = vpop.permute.xlu1 %785 }
 0x132   : > { %v792_v20 = vsel %vm791_vm0, %v784_v33, %v786_v9 }
 0x134   : > { %v753_v4 = vpop.permute.xlu0 %752 }
 0x138   : > { %v815_v15 = vpop.permute.xlu0 %814 }
 0x13a   : > { %v877_v16 = vpop.permute.xlu1 %876 }
 0x13c   : > { %v846_v21 = vpop.permute.xlu0 %845 }
 0x13e   : > { %v879_v3 = vpop.permute.xlu1 %878 }
 0x13f   : > { %v885_v53 = vsel %vm884_vm3, %v877_v16, %v879_v3 }
 0x140   : > { %v908_v54 = vpop.permute.xlu0 %907 }
 0x142   : > { %v722_v18 = vpop.permute.xlu1 %721 }
 0x146   : > { %v724_v36 = vpop.permute.xlu1 %723 }
 0x147   : > { %v730_v10 = vsel %vm729_vm14, %v722_v18, %v724_v36 }
 0x148   : > { %v734_v17 = vadd.f32 %v730_v10, %v703_v11 }
 0x14a   : > { %v755_v13 = vpop.permute.xlu1 %754 }
 0x14b   : > { %v761_v32 = vsel %vm760_vm15, %v753_v4, %v755_v13 }
 0x14c   : > { %v765_v35 = vadd.f32 %v761_v32, %v734_v17 }
 0x14e   : > { %v796_v24 = vadd.f32 %v792_v20, %v765_v35  ;;  %v817_v27 = vpop.permute.xlu1 %816 }
 0x14f   : > { %v823_v43 = vsel %vm822_vm1, %v815_v15, %v817_v27 }
 0x150   : > { %v827_v44 = vadd.f32 %v823_v43, %v796_v24 }
 0x151   : > { %v670_v40 = vpop.permute.xlu0 %669 }
 0x152   : > { %v848_v28 = vpop.permute.xlu1 %847  ;;  %v673_v5 = vmul.f32 %v670_v40, %v1782_v61 }
 0x153   : > { %v854_v30 = vsel %vm853_vm2, %v846_v21, %v848_v28 }
 0x154   : > { %v858_v34 = vadd.f32 %v854_v30, %v827_v44 }
 0x155   : > { %v697_v45 = vpop.permute.xlu0 %696 }
 0x156   : > { %v889_v38 = vadd.f32 %v885_v53, %v858_v34  ;;  %v910_v31 = vpop.permute.xlu1 %909 }
 0x157   : > { %v916_v39 = vsel %vm915_vm4, %v908_v54, %v910_v31 }
 0x158   : > { %v920_v7 = vadd.f32 %v916_v39, %v889_v38 }
 0x159   : > { %v790_v48 = vpop.permute.xlu0 %789 }
 0x15a   : > { %v1815_v41 = vadd.f32 %v927_v8, %v920_v7  ;;  %v695_v51 = vpop.permute.xlu1 %694 }
 0x15b   : > { %v700_v2 = vsel %vm698_vm13, %v695_v51, %v697_v45 }
 0x15c   : > { %v1818_v42 = vmul.f32 0.70710677, %v1815_v41  ;;  %v704_v9 = vadd.f32 %v700_v2, %v673_v5 }
 0x15d   : > { %v881_v50 = vpop.permute.xlu0 %880 }
 0x15e   : > { %v938_v46 = vand.u32 2147483647, %v1818_v42  ;;  %v788_v52 = vpop.permute.xlu1 %787  ;;  %vm960_vm5 = vcmp.ge.f32.partialorder %v1818_v42, 0.0 }
 0x15f   : > { %v793_v11 = vsel %vm791_vm0, %v788_v52, %v790_v48 }
 0x160   : > { %v939_v49 = vmul.f32 0.3275911, %v938_v46  ;;  %v954_v58 = vsub.f32 0.0, %v938_v46 }
 0x161   : > { %v728_v56 = vpop.permute.xlu0 %727 }
 0x162   : > { %v940_v63 = vadd.f32 1.0, %v939_v49  ;;  %v955_v62 = vmul.f32 %v954_v58, %v938_v46  ;;  %v936_v49 = vmul.f32 0.5, %v1815_v41 }
 0x164   : > { %1344 = vrcp.f32 %v940_v63  ;;  %v956_v14 = vmul.f32 1.442695, %v955_v62 }
 0x165   : > { %v759_v19 = vpop.permute.xlu0 %758 }
 0x166   : > { %1346 = vpow2.f32 %v956_v14 }
 0x169   : > { %v821_v18 = vpop.permute.xlu0 %820 }
 0x16d   : > { %v852_v35 = vpop.permute.xlu0 %851 }
 0x16e   : > { %v1345_v23 = vpop.eup %1344 }
 0x16f   : > { %v942_v55 = vmul.f32 %v1345_v23, %v940_v63  ;;  %v932_v57 = vpop.permute.xlu1 %931 }
 0x170   : > { %v1347_v28 = vpop.eup %1346 }
 0x171   : > { %v943_v59 = vsub.f32 2.0, %v942_v55  ;;  %v912_v53 = vpop.permute.xlu0 %911 }
 0x173   : > { %v944_v60 = vmul.f32 %v1345_v23, %v943_v59  ;;  %v883_v29 = vpop.permute.xlu1 %882  ;;  %v1012_v59 = vsub.s32 4, %v1667_v22 }
 0x174   : > { %v886_v30 = vsel %vm884_vm3, %v881_v50, %v883_v29 }
 0x175   : > { %v945_v0 = vmul.f32 1.0614054, %v944_v60 }
 0x177   : > { %v726_v6 = vpop.permute.xlu1 %725  ;;  %v946_v1 = vadd.f32 -1.4531521, %v945_v0 }
 0x178   : > { %v731_v8 = vsel %vm729_vm14, %v726_v6, %v728_v56 }
 0x179   : > { %v947_v16 = vmul.f32 %v946_v1, %v944_v60  ;;  %v735_v33 = vadd.f32 %v731_v8, %v704_v9  ;;  %v1042_v9 = vsub.s32 7, %v1667_v22 }
 0x17b   : > { %v757_v3 = vpop.permute.xlu1 %756  ;;  %v948_v4 = vadd.f32 1.4214138, %v947_v16 }
 0x17c   : > { %v762_v12 = vsel %vm760_vm15, %v757_v3, %v759_v19 }
 0x17d   : > { %v766_v36 = vadd.f32 %v762_v12, %v735_v33  ;;  %v949_v10 = vmul.f32 %v948_v4, %v944_v60 }
 0x17f   : > { %v797_v15 = vadd.f32 %v793_v11, %v766_v36  ;;  %v819_v61 = vpop.permute.xlu1 %818  ;;  %v950_v17 = vadd.f32 -0.28449672, %v949_v10 }
 0x180   : > { %v824_v13 = vsel %vm822_vm1, %v819_v61, %v821_v18  ;;  %v969_v50 = vpop.permute.xlu0 %968 }
 0x181   : > { %v951_v32 = vmul.f32 %v950_v17, %v944_v60  ;;  %v828_v20 = vadd.f32 %v824_v13, %v797_v15 }
 0x183   : > { %v850_v21 = vpop.permute.xlu1 %849  ;;  %v952_v24 = vadd.f32 0.2548296, %v951_v32 }
 0x184   : > { %v855_v27 = vsel %vm853_vm2, %v850_v21, %v852_v35 }
 0x185   : > { %v859_v43 = vadd.f32 %v855_v27, %v828_v20  ;;  %v953_v44 = vmul.f32 %v952_v24, %v944_v60  ;;  %v988_v42 = vpop.permute.xlu0 %987 }
 0x187   : > { %v958_v54 = vmul.f32 %v1347_v28, %v953_v44  ;;  %v914_v34 = vpop.permute.xlu1 %913  ;;  %v890_v38 = vadd.f32 %v886_v30, %v859_v43 }
 0x188   : > { %v917_v39 = vsel %vm915_vm4, %v912_v53, %v914_v34 }
 0x189   : > { %v959_v31 = vsub.f32 1.0, %v958_v54  ;;  %v921_v45 = vadd.f32 %v917_v39, %v890_v38 }
 0x18a   : > { %v1018_v1 = vpop.permute.xlu0 %1017 }
 0x18b   : > { %v961_v40 = vsub.f32 0.0, %v959_v31  ;;  %v978_v7 = vpop.permute.xlu1 %977  ;;  %v935_v51 = vadd.f32 %v932_v57, %v921_v45  ;;  %v1022_v57 = vsub.s32 5, %v1667_v22 }
 0x18d   : > { %v962_v46 = vsel %vm960_vm5, %v959_v31, %v961_v40 }
 0x18e   : > { %v963_v63 = vadd.f32 1.0, %v962_v46 }
 0x18f   : > { %v1050_v11 = vpop.permute.xlu0 %1049 }
 0x190   : > { %v964_v48 = vmul.f32 %v963_v63, %v936_v49  ;;  %v998_v52 = vpop.permute.xlu1 %997 }
 0x192   : > { %v965_v23 = vmul.f32 %v964_v48, %v935_v51 }
 0x194   : > { %v974_v55 = vrot.slane %v965_v23, %v1670_v25  ;;  %v983_v58 = vrot.slane %v965_v23, %v1673_v26  ;;  %v993_v56 = vrot.slane %v965_v23, %v1688_v37  ;;  %v1003_v41 = vrot.slane %v965_v23, %v1704_v47 }
 0x195   : > { %v1008_v60 = vpop.permute.xlu1 %1007  ;;  %v1013_v19 = vrot.slane %v965_v23, %v1012_v59  ;;  %v1023_v26 = vrot.slane %v965_v23, %v1022_v57  ;;  %v1032_v37 = vsub.s32 6, %v1667_v22  ;;  %v1043_v12 = vrot.slane %v965_v23, %v1042_v9 }
 0x196   : > { %v975_v29 = vmul.f32 %v974_v55, %v969_v50  ;;  %v984_v62 = vmul.f32 %v983_v58, %v978_v7  ;;  %v994_v2 = vmul.f32 %v993_v56, %v988_v42  ;;  %v1004_v5 = vmul.f32 %v1003_v41, %v998_v52 }
 0x197   : > { %v1014_v8 = vmul.f32 %v1013_v19, %v1008_v60  ;;  %v1024_v47 = vmul.f32 %v1023_v26, %v1018_v1  ;;  %v1033_v33 = vrot.slane %v965_v23, %v1032_v37 }
 0x198   : > { %v985_v0 = vadd.f32 %v984_v62, %v975_v29 }
 0x19a   : > { %v995_v25 = vadd.f32 %v994_v2, %v985_v0  ;;  %v1028_v6 = vpop.permute.xlu1 %1027 }
 0x19b   : > { %v1034_v18 = vmul.f32 %v1033_v33, %v1028_v6 }
 0x19c   : > { %v1005_v14 = vadd.f32 %v1004_v5, %v995_v25 }
 0x19e   : > { %v1015_v16 = vadd.f32 %v1014_v8, %v1005_v14 }
 0x19f   : > { %v1038_v3 = vpop.permute.xlu1 %1037 }
 0x1a0   : > { %v1025_v4 = vadd.f32 %v1024_v47, %v1015_v16  ;;  %v1044_v10 = vmul.f32 %v1043_v12, %v1038_v3 }
 0x1a2   : > { %v1035_v36 = vadd.f32 %v1034_v18, %v1025_v4 }
 0x1a4   : > { %v1045_v15 = vadd.f32 %v1044_v10, %v1035_v36 }
 0x1a6   : > { %v1052_v61 = vadd.f32 %v1050_v11, %v1045_v15 }
 0x1a8   : > { %1053 = vst [vmem:[%s423_s21] sm:$0xf] %v1052_v61 }
 0x1a9   : > { %1361 = shalt.err (!%p1358_p12)
}
 0x1aa   : > { %s1362_s28 = scalar_lea.hbm %s1846_s13, 64  ;;  %s1366_s20 = scalar_lea.hbm %s1908_s9, 256 }
 0x1ab   : > { %p1363_p13 = scmp.ne.s32.totalorder %s1846_s13, %s1362_s28  ;;  %p1367_p2 = scmp.lt.u32.totalorder %s1846_s13, %s1908_s9 }
 0x1ac   : > { %p1368_p4 = scmp.lt.u32.totalorder %s1366_s20, %s1362_s28  ;;  %p1370_p6 = scmp.lt.u32.totalorder %s1362_s28, %s1846_s13 }
 0x1ad   : > { %p1364_p0 = pnand %p1363_p13, %p1565_p3 }
 0x1ae   : > { %p1369_p5 = por %p1368_p4, %p1367_p2 }
 0x1af   : > { %p1365_p1 = pneg %p1364_p0 }
 0x1b0   : > { %p1371_p7 = por %p1370_p6, %p1369_p5 }
 0x1b2   : > { %p1372_p9 = pnand %p1371_p7, %p1365_p1 }
 0x1b4   : > { %1375 = shalt.err (!%p1372_p9)
}
 0x1b5   : > { %1218 = dma.vmem_to_hbm [thread:$0]  (%p1565_p3), %s1848_s0, 64, %s1846_s13, %s1055_s12  }
 0x1b6 PF: > { %p1224_p10 = scmp.ge.s32.totalorder %s1442_s16, 2  ;;  %s1082_s17 = sand.u32 1, %s1414_s30  }
 0x1b7   : > { %s1083_s21 = scalar_lea.sflag [#allocation3], %s1082_s17 }
 0x1b8   : > { %p1221_p11 = pnand %p1224_p10, %p1574_p8 }
 0x1ba   : > { %1409 = dma.done.wait (!%p1221_p11), %s1083_s21, 64  }
 0x1bb   : > { %1411 = vsyncadd (!%p1221_p11), %s1083_s21, 4294967232  ;;  %s22_s16 = sadd.s32 1, %s1442_s16   ;;  %s1928_s11 = sld [smem:[#allocation5_spill]] }
 0x1bc   : > { %p19_p12 = scmp.ge.s32.totalorder %s22_s16, 6   ;;  %s1929_s22 = sld [smem:[#allocation11_spill]] }
 0x1bd   : > { %s1930_s12 = sld [smem:[#allocation6_spill]]  ;;  %s1931_s13 = sld [smem:[#allocation7_spill]] }
 0x1be   : > { %s1932_s14 = sld [smem:[#allocation8_spill]]  ;;  %s1933_s15 = sld [smem:[#allocation9_spill]] }
 0x1bf   : > { %s1934_s30 = smov %s1418_s10  ;;  %21 = sbr.rel (!%p19_p12) target bundleno = 7 (0x7), region = 97 }
 0x1c1   : > { %s1935_s10 = smov %s1928_s11 }
 0x1c2   : > { %s1936_s11 = smov %s1929_s22 }
 0x1c6   :  { %1088 = vsyncpa [#allocation3], 1 }
 0x1c7   :  { %1090 = vsyncpa [#allocation3 + $0x1], 1 }

</bundles_post_ra>
